<compile_context>
chip_gen: v7x
topology: tpu7x:2x2x1
jax: 0.10.0
libtpu: 0.0.40
codegen_flags: <defaults>
</compile_context>

<pallas_src>
import functools

import jax
import jax.numpy as jnp
from jax.experimental import pallas as pl
from jax.experimental.pallas import tpu as pltpu

SMOOTH = 1e-6

_MIN_TS = 512
_MAX_TS = 65536
_F32_TEMPS = 6          # (C, TS) f32 temporaries materialized in the body
_BUDGET_FRAC = 0.45     # of VMEM capacity for (2x-buffered inputs + temporaries)
_LIMIT_FRAC = 0.85      # scoped-VMEM limit requested from the compiler


def _vmem_capacity_bytes():
    try:
        cap = int(getattr(pltpu.get_tpu_info(), "vmem_capacity_bytes", 0))
        if cap > 0:
            return cap
    except Exception:
        pass
    return 64 * 1024 * 1024     # conservative fallback (v7x per-core VMEM)


def _choose_spatial_tile(S, C, pred_bytes, tgt_bytes_per_lane, spatial_tile):
    """Lane tile TS: a multiple of 128, or == S (single full-extent tile)."""
    if spatial_tile is not None:
        ts = int(spatial_tile)
        if ts >= S:
            return S
        return max(128, (ts // 128) * 128)
    if S <= _MIN_TS:
        return S
    per_lane = 2 * (C * pred_bytes + tgt_bytes_per_lane) + _F32_TEMPS * C * 4
    ts = int(_BUDGET_FRAC * _vmem_capacity_bytes()) // per_lane
    ts = max(_MIN_TS, min(_MAX_TS, ts))
    ts = (ts // 128) * 128
    if ts >= S:
        return S
    return ts


def _make_kernel(C, TS, S, tiles_per_split, needs_mask, from_labels):
    def _accumulate(p_ref, t_ref, iacc, dacc, masked, sp, s):
        p = p_ref[0].astype(jnp.float32)                     # (C, TS) logits
        if from_labels:
            lab = t_ref[0].astype(jnp.int32)                 # (1, TS) class ids
            cls = jax.lax.broadcasted_iota(jnp.int32, (C, 1), 0)
            t = (lab == cls).astype(jnp.float32)             # (C, TS) one-hot
        else:
            t = t_ref[0].astype(jnp.float32)                 # (C, TS) one-hot

        # softmax over the channel axis (PyTorch dim=1)
        m = jnp.max(p, axis=0, keepdims=True)                # (1, TS)
        e = jnp.exp(p - m)                                   # (C, TS)
        z = jnp.sum(e, axis=0, keepdims=True)                # (1, TS)
        sm = e * pl.reciprocal(z, approx=True)               # (C, TS)

        if masked:
            lane = jax.lax.broadcasted_iota(jnp.int32, (1, TS), 1)
            valid = ((sp * tiles_per_split + s) * TS + lane) < S   # (1, TS)
            sm = jnp.where(valid, sm, 0.0)
            t = jnp.where(valid, t, 0.0)

        # in-kernel-built one-hot is an exact indicator => t*t == t
        tsq = t if from_labels else t * t
        iacc[...] += jnp.sum(sm * t, axis=1, keepdims=True)             # (C, 1)
        dacc[...] += jnp.sum(sm * sm + tsq, axis=1, keepdims=True)      # (C, 1)

    def kernel(p_ref, t_ref, inter_ref, denom_ref, iacc, dacc):
        sp = pl.program_id(0)                    # spatial split (megacore)
        s = pl.program_id(2)                     # spatial tile within split
        last_s = pl.num_programs(2) - 1

        @pl.when(s == 0)
        def _init():
            iacc[...] = jnp.zeros_like(iacc)
            dacc[...] = jnp.zeros_like(dacc)

        if needs_mask:
            ragged = jnp.logical_and(sp == pl.num_programs(0) - 1, s == last_s)

            @pl.when(jnp.logical_not(ragged))
            def _full_tile():
                _accumulate(p_ref, t_ref, iacc, dacc, False, sp, s)

            @pl.when(ragged)
            def _ragged_tile():
                _accumulate(p_ref, t_ref, iacc, dacc, True, sp, s)
        else:
            _accumulate(p_ref, t_ref, iacc, dacc, False, sp, s)

        @pl.when(s == last_s)
        def _finalize():
            inter_ref[0, 0] = iacc[...]
            denom_ref[0, 0] = dacc[...]

    return kernel


def _dice_loss_impl(predict, target, from_labels, spatial_tile):
    N, C = predict.shape[0], predict.shape[1]
    S = 1
    for d in predict.shape[2:]:
        S *= d

    p = predict.reshape(N, C, S)
    if from_labels:
        t = target.reshape(N, 1, S)
        if t.dtype != jnp.int32:
            t = t.astype(jnp.int32)          # tiny (N*S) stream
        tgt_bytes_per_lane = 4
    else:
        t = target.reshape(N, C, S)          # streamed at native dtype; cast in-kernel
        tgt_bytes_per_lane = C * t.dtype.itemsize

    TS = _choose_spatial_tile(S, C, p.dtype.itemsize, tgt_bytes_per_lane, spatial_tile)
    num_tiles = (S + TS - 1) // TS
    needs_mask = (S % TS) != 0

    # When N == 1, split the spatial axis across two parallel grid slices so
    # both TensorCores of a v7x megacore get work (no-op on 1-TC chips).
    splits = 2 if (N == 1 and num_tiles >= 2 and num_tiles % 2 == 0) else 1
    tiles_per_split = num_tiles // splits

    kernel = _make_kernel(C, TS, S, tiles_per_split, needs_mask, from_labels)

    if from_labels:
        t_spec = pl.BlockSpec((1, 1, TS),
                              lambda sp, n, s: (n, 0, sp * tiles_per_split + s))
    else:
        t_spec = pl.BlockSpec((1, C, TS),
                              lambda sp, n, s: (n, 0, sp * tiles_per_split + s))

    cost = pl.CostEstimate(
        flops=int(10 * N * C * S),
        transcendentals=int(N * C * S + N * S),
        bytes_accessed=int(N * C * S * p.dtype.itemsize
                           + t.size * t.dtype.itemsize
                           + splits * N * C * 8),
    )

    inter, denom = pl.pallas_call(
        kernel,
        out_shape=(
            jax.ShapeDtypeStruct((splits, N, C, 1), jnp.float32),
            jax.ShapeDtypeStruct((splits, N, C, 1), jnp.float32),
        ),
        grid_spec=pltpu.PrefetchScalarGridSpec(
            num_scalar_prefetch=0,
            grid=(splits, N, tiles_per_split),
            in_specs=[
                pl.BlockSpec((1, C, TS),
                             lambda sp, n, s: (n, 0, sp * tiles_per_split + s)),
                t_spec,
            ],
            out_specs=[
                pl.BlockSpec((1, 1, C, 1), lambda sp, n, s: (sp, n, 0, 0)),
                pl.BlockSpec((1, 1, C, 1), lambda sp, n, s: (sp, n, 0, 0)),
            ],
            scratch_shapes=[
                pltpu.VMEM((C, 1), jnp.float32),   # per-class intersection acc
                pltpu.VMEM((C, 1), jnp.float32),   # per-class denominator acc
            ],
        ),
        compiler_params=pltpu.CompilerParams(
            dimension_semantics=("parallel", "parallel", "arbitrary"),
            vmem_limit_bytes=int(_LIMIT_FRAC * _vmem_capacity_bytes()),
        ),
        cost_estimate=cost,
    )(p, t)

    inter = jnp.sum(inter[..., 0], axis=0)       # (N, C)
    denom = jnp.sum(denom[..., 0], axis=0)       # (N, C)
    per_class = 1.0 - (2.0 * inter + SMOOTH) / (denom + SMOOTH)
    # TODO(synk): `weight` / `ignore_index` constructor options are not implemented.
    return jnp.sum(per_class, axis=1) / C        # [N], reduction='none'


@functools.partial(jax.jit, static_argnames=("spatial_tile",))
def dice_loss(predict, target, spatial_tile=None):
    """predict, target: [N, C, *spatial] (target one-hot over C, per the module
    docs).  Returns [N] float32 — DiceLoss(reduction='none')."""
    assert predict.shape == target.shape, "predict & target shape do not match"
    return _dice_loss_impl(predict, target, from_labels=False,
                           spatial_tile=spatial_tile)


@functools.partial(jax.jit, static_argnames=("spatial_tile",))
def dice_loss_from_labels(predict, labels, spatial_tile=None):
    """predict: [N, C, *spatial]; labels: [N, *spatial] integer class indices.
    Traffic-optimal path: the one-hot target is built in-kernel."""
    assert labels.shape == predict.shape[:1] + predict.shape[2:], \
        "labels must have predict's shape without the channel dim"
    return _dice_loss_impl(predict, labels, from_labels=True,
                           spatial_tile=spatial_tile)


def _dice_loss_ref(predict, target):
    # pure-JAX reference mirroring the PyTorch module
    N, C = predict.shape[0], predict.shape[1]
    p = jax.nn.softmax(predict.astype(jnp.float32), axis=1).reshape(N, C, -1)
    t = target.astype(jnp.float32).reshape(N, C, -1)
    total = jnp.zeros((N,), jnp.float32)
    for i in range(C):
        num = 2.0 * jnp.sum(p[:, i] * t[:, i], axis=1) + SMOOTH
        den = jnp.sum(p[:, i] ** 2 + t[:, i] ** 2, axis=1) + SMOOTH
        total = total + (1.0 - num / den)
    return total / C


if __name__ == "__main__":
    key = jax.random.PRNGKey(0)
    k1, k2, k3, k4, k5, k6 = jax.random.split(key, 6)

    # 1) one-hot API path (matches the PyTorch module signature)
    N, C, H, W = 2, 4, 16, 16
    predict = jax.random.normal(k1, (N, C, H, W), dtype=jnp.float32)
    labels = jax.random.randint(k2, (N, H, W), 0, C)
    target = jax.nn.one_hot(labels, C, dtype=jnp.float32).transpose(0, 3, 1, 2)

    out = jax.block_until_ready(dice_loss(predict, target))
    ref = _dice_loss_ref(predict, target)
    assert out.shape == (N,)
    assert jnp.allclose(out, ref, rtol=5e-3, atol=5e-3), (out, ref)

    # 2) labels path (one-hot built in-kernel)
    out_lab = jax.block_until_ready(dice_loss_from_labels(predict, labels))
    assert jnp.allclose(out_lab, ref, rtol=5e-3, atol=5e-3), (out_lab, ref)

    # 3) ragged spatial extent — exercises in-kernel last-tile masking (no pad)
    N2, C2, H2, W2 = 2, 4, 10, 33            # S = 330, not a multiple of 128
    predict2 = jax.random.normal(k3, (N2, C2, H2, W2), dtype=jnp.float32)
    labels2 = jax.random.randint(k4, (N2, H2, W2), 0, C2)
    target2 = jax.nn.one_hot(labels2, C2, dtype=jnp.float32).transpose(0, 3, 1, 2)
    out2 = jax.block_until_ready(dice_loss(predict2, target2, spatial_tile=128))
    ref2 = _dice_loss_ref(predict2, target2)
    assert jnp.allclose(out2, ref2, rtol=5e-3, atol=5e-3), (out2, ref2)

    # 4) N == 1 — spatial axis split across two parallel grid slices (v7x)
    N3, C3, H3, W3 = 1, 4, 16, 32            # S = 512 -> 4 tiles of 128 -> 2 splits
    predict3 = jax.random.normal(k5, (N3, C3, H3, W3), dtype=jnp.float32)
    labels3 = jax.random.randint(k6, (N3, H3, W3), 0, C3)
    target3 = jax.nn.one_hot(labels3, C3, dtype=jnp.float32).transpose(0, 3, 1, 2)
    out3 = jax.block_until_ready(
        dice_loss_from_labels(predict3, labels3, spatial_tile=128))
    ref3 = _dice_loss_ref(predict3, target3)
    assert jnp.allclose(out3, ref3, rtol=5e-3, atol=5e-3), (out3, ref3)

    print("KERNEL_OK")
</pallas_src>

<mosaic_0001>
module attributes {stable_mosaic.version = 11 : i64} {
  func.func @kernel(%arg0: i32, %arg1: i32, %arg2: i32, %arg3: memref<1x4x256xf32, #tpu.memory_space<vmem>>, %arg4: memref<1x4x256xf32, #tpu.memory_space<vmem>>, %arg5: memref<1x1x4x1xf32, #tpu.memory_space<vmem>>, %arg6: memref<1x1x4x1xf32, #tpu.memory_space<vmem>>, %arg7: memref<4x1xf32, #tpu.memory_space<vmem>>, %arg8: memref<4x1xf32, #tpu.memory_space<vmem>>) attributes {dimension_semantics = [#tpu.dimension_semantics<parallel>, #tpu.dimension_semantics<parallel>, #tpu.dimension_semantics<arbitrary>], iteration_bounds = array<i64: 1, 2, 1>, scalar_prefetch = 0 : i64, scratch_operands = 2 : i64, tpu.core_type = #tpu.core_type<tc>, window_params = [{transform_indices = @transform_0, window_bounds = array<i64: 1, 4, 256>}, {transform_indices = @transform_1, window_bounds = array<i64: 1, 4, 256>}, {transform_indices = @transform_2, window_bounds = array<i64: 1, 1, 4, 1>}, {transform_indices = @transform_3, window_bounds = array<i64: 1, 1, 4, 1>}]} {
    %c0_i32 = arith.constant 0 : i32
    %0 = arith.cmpi eq, %arg2, %c0_i32 : i32
    %1 = arith.extui %0 : i1 to i32
    %c0_i32_0 = arith.constant 0 : i32
    %2 = arith.cmpi ne, %1, %c0_i32_0 : i32
    scf.if %2 {
      %cst_19 = arith.constant 0.000000e+00 : f32
      %34 = vector.broadcast %cst_19 : f32 to vector<4x1xf32>
      %c0_20 = arith.constant 0 : index
      %c0_21 = arith.constant 0 : index
      %35 = vector.load %arg7[%c0_20, %c0_21] : memref<4x1xf32, #tpu.memory_space<vmem>>, vector<4x1xf32>
      tpu.vector_store %arg7[%c0_20, %c0_21], %34 {strides = array<i32>} : memref<4x1xf32, #tpu.memory_space<vmem>>, vector<4x1xf32>,
      %cst_22 = arith.constant 0.000000e+00 : f32
      %36 = vector.broadcast %cst_22 : f32 to vector<4x1xf32>
      %c0_23 = arith.constant 0 : index
      %c0_24 = arith.constant 0 : index
      %37 = vector.load %arg8[%c0_23, %c0_24] : memref<4x1xf32, #tpu.memory_space<vmem>>, vector<4x1xf32>
      tpu.vector_store %arg8[%c0_23, %c0_24], %36 {strides = array<i32>} : memref<4x1xf32, #tpu.memory_space<vmem>>, vector<4x1xf32>,
    } else {
    }
    %c0 = arith.constant 0 : index
    %c0_1 = arith.constant 0 : index
    %c0_2 = arith.constant 0 : index
    %3 = vector.load %arg3[%c0, %c0_1, %c0_2] : memref<1x4x256xf32, #tpu.memory_space<vmem>>, vector<1x4x256xf32>
    %4 = vector.shape_cast %3 : vector<1x4x256xf32> to vector<4x256xf32>
    %c0_3 = arith.constant 0 : index
    %c0_4 = arith.constant 0 : index
    %c0_5 = arith.constant 0 : index
    %5 = vector.load %arg4[%c0_3, %c0_4, %c0_5] : memref<1x4x256xf32, #tpu.memory_space<vmem>>, vector<1x4x256xf32>
    %6 = vector.shape_cast %5 : vector<1x4x256xf32> to vector<4x256xf32>
    %cst = arith.constant dense<0xFF800000> : vector<256xf32>
    %7 = vector.multi_reduction <maximumf>, %4, %cst [0] : vector<4x256xf32> to vector<256xf32>
    %8 = vector.shape_cast %7 : vector<256xf32> to vector<1x256xf32>
    %9 = vector.broadcast %8 : vector<1x256xf32> to vector<4x256xf32>
    %10 = arith.subf %4, %9 : vector<4x256xf32>
    %11 = math.exp %10 : vector<4x256xf32>
    %cst_6 = arith.constant dense<0.000000e+00> : vector<256xf32>
    %12 = vector.multi_reduction <add>, %11, %cst_6 [0] : vector<4x256xf32> to vector<256xf32>
    %13 = vector.shape_cast %12 : vector<256xf32> to vector<1x256xf32>
    %14 = tpu.reciprocal %13 {approx = true} : vector<1x256xf32> -> vector<1x256xf32>
    %15 = vector.broadcast %14 : vector<1x256xf32> to vector<4x256xf32>
    %16 = arith.mulf %11, %15 : vector<4x256xf32>
    %17 = arith.mulf %6, %6 : vector<4x256xf32>
    %c0_7 = arith.constant 0 : index
    %c0_8 = arith.constant 0 : index
    %18 = vector.load %arg7[%c0_7, %c0_8] : memref<4x1xf32, #tpu.memory_space<vmem>>, vector<4x1xf32>
    %19 = arith.mulf %16, %6 : vector<4x256xf32>
    %cst_9 = arith.constant dense<0.000000e+00> : vector<4xf32>
    %20 = vector.multi_reduction <add>, %19, %cst_9 [1] : vector<4x256xf32> to vector<4xf32>
    %21 = vector.shape_cast %20 : vector<4xf32> to vector<4x1xf32>
    %22 = arith.addf %18, %21 : vector<4x1xf32>
    %c0_10 = arith.constant 0 : index
    %c0_11 = arith.constant 0 : index
    %23 = vector.load %arg7[%c0_10, %c0_11] : memref<4x1xf32, #tpu.memory_space<vmem>>, vector<4x1xf32>
    tpu.vector_store %arg7[%c0_10, %c0_11], %22 {strides = array<i32>} : memref<4x1xf32, #tpu.memory_space<vmem>>, vector<4x1xf32>,
    %c0_12 = arith.constant 0 : index
    %c0_13 = arith.constant 0 : index
    %24 = vector.load %arg8[%c0_12, %c0_13] : memref<4x1xf32, #tpu.memory_space<vmem>>, vector<4x1xf32>
    %25 = arith.mulf %16, %16 : vector<4x256xf32>
    %26 = arith.addf %25, %17 : vector<4x256xf32>
    %cst_14 = arith.constant dense<0.000000e+00> : vector<4xf32>
    %27 = vector.multi_reduction <add>, %26, %cst_14 [1] : vector<4x256xf32> to vector<4xf32>
    %28 = vector.shape_cast %27 : vector<4xf32> to vector<4x1xf32>
    %29 = arith.addf %24, %28 : vector<4x1xf32>
    %c0_15 = arith.constant 0 : index
    %c0_16 = arith.constant 0 : index
    %30 = vector.load %arg8[%c0_15, %c0_16] : memref<4x1xf32, #tpu.memory_space<vmem>>, vector<4x1xf32>
    tpu.vector_store %arg8[%c0_15, %c0_16], %29 {strides = array<i32>} : memref<4x1xf32, #tpu.memory_space<vmem>>, vector<4x1xf32>,
    %c0_i32_17 = arith.constant 0 : i32
    %31 = arith.cmpi eq, %arg2, %c0_i32_17 : i32
    %32 = arith.extui %31 : i1 to i32
    %c0_i32_18 = arith.constant 0 : i32
    %33 = arith.cmpi ne, %32, %c0_i32_18 : i32
    scf.if %33 {
      %c0_19 = arith.constant 0 : index
      %c0_20 = arith.constant 0 : index
      %34 = vector.load %arg7[%c0_19, %c0_20] : memref<4x1xf32, #tpu.memory_space<vmem>>, vector<4x1xf32>
      %c0_21 = arith.constant 0 : index
      %c0_22 = arith.constant 0 : index
      %c0_23 = arith.constant 0 : index
      %c0_24 = arith.constant 0 : index
      %35 = vector.load %arg5[%c0_21, %c0_22, %c0_23, %c0_24] : memref<1x1x4x1xf32, #tpu.memory_space<vmem>>, vector<1x1x4x1xf32>
      %36 = vector.shape_cast %35 : vector<1x1x4x1xf32> to vector<4x1xf32>
      %37 = vector.shape_cast %34 : vector<4x1xf32> to vector<1x1x4x1xf32>
      tpu.vector_store %arg5[%c0_21, %c0_22, %c0_23, %c0_24], %37 {strides = array<i32>} : memref<1x1x4x1xf32, #tpu.memory_space<vmem>>, vector<1x1x4x1xf32>,
      %c0_25 = arith.constant 0 : index
      %c0_26 = arith.constant 0 : index
      %38 = vector.load %arg8[%c0_25, %c0_26] : memref<4x1xf32, #tpu.memory_space<vmem>>, vector<4x1xf32>
      %c0_27 = arith.constant 0 : index
      %c0_28 = arith.constant 0 : index
      %c0_29 = arith.constant 0 : index
      %c0_30 = arith.constant 0 : index
      %39 = vector.load %arg6[%c0_27, %c0_28, %c0_29, %c0_30] : memref<1x1x4x1xf32, #tpu.memory_space<vmem>>, vector<1x1x4x1xf32>
      %40 = vector.shape_cast %39 : vector<1x1x4x1xf32> to vector<4x1xf32>
      %41 = vector.shape_cast %38 : vector<4x1xf32> to vector<1x1x4x1xf32>
      tpu.vector_store %arg6[%c0_27, %c0_28, %c0_29, %c0_30], %41 {strides = array<i32>} : memref<1x1x4x1xf32, #tpu.memory_space<vmem>>, vector<1x1x4x1xf32>,
    } else {
    }
    return
  }
  func.func @transform_0(%arg0: i32, %arg1: i32, %arg2: i32) -> (i32, i32, i32) {
    %c1_i32 = arith.constant 1 : i32
    %0 = arith.muli %arg0, %c1_i32 : i32
    %1 = arith.addi %0, %arg2 : i32
    %c0_i32 = arith.constant 0 : i32
    %c0_i32_0 = arith.constant 0 : i32
    return %arg1, %c0_i32, %1 : i32, i32, i32
  }
  func.func @transform_1(%arg0: i32, %arg1: i32, %arg2: i32) -> (i32, i32, i32) {
    %c1_i32 = arith.constant 1 : i32
    %0 = arith.muli %arg0, %c1_i32 : i32
    %1 = arith.addi %0, %arg2 : i32
    %c0_i32 = arith.constant 0 : i32
    %c0_i32_0 = arith.constant 0 : i32
    return %arg1, %c0_i32, %1 : i32, i32, i32
  }
  func.func @transform_2(%arg0: i32, %arg1: i32, %arg2: i32) -> (i32, i32, i32, i32) {
    %c0_i32 = arith.constant 0 : i32
    %c0_i32_0 = arith.constant 0 : i32
    %c0_i32_1 = arith.constant 0 : i32
    return %arg0, %arg1, %c0_i32, %c0_i32_0 : i32, i32, i32, i32
  }
  func.func @transform_3(%arg0: i32, %arg1: i32, %arg2: i32) -> (i32, i32, i32, i32) {
    %c0_i32 = arith.constant 0 : i32
    %c0_i32_0 = arith.constant 0 : i32
    %c0_i32_1 = arith.constant 0 : i32
    return %arg0, %arg1, %c0_i32, %c0_i32_0 : i32, i32, i32, i32
  }
}

</mosaic_0001>

<bundles_post_ra>
// kernel: dice_loss.1
= control target key start
LH: loop header
LB: loop body
LE: loop exit
PB: predicated region body
PF: predicated region fallthrough
CT: control target
= control target key end

     0   :  { %s620_s12 = smov 0   ;;  %s622_s13 = smov 0   ;;  %s681_s0 = inlined_call_operand.vmem [shape: f32[2,4,256], index: 0, kind: input, shape index: {}]   ;;  %s682_s1 = inlined_call_operand.vmem [shape: f32[2,4,256], index: 1, kind: input, shape index: {}]   ;;  %s683_s2 = inlined_call_operand.vmem [shape: f32[1,2,4,1], index: 2, kind: output, shape index: {0}]   ;;  %s684_s3 = inlined_call_operand.vmem [shape: f32[1,2,4,1], index: 3, kind: output, shape index: {1}]  }
   0x1   :  { %s624_s14 = smov 0  }
   0x2 LB: > { %s29_s15 = sadd.s32 1, %s593_s13  ;;  %p532_p0 = scmp.ge.s32.totalorder %s597_s14, 1  ;;  %s597_s14 = sphi %s624_s14, %s14_s14   ;;  %s593_s13 = sphi %s622_s13, %s686_s13   ;;  %s589_s12 = sphi %s620_s12, %s685_s12  }
   0x3   : > { %p31_p1 = scmp.ge.s32.totalorder %s29_s15, 2  ;;  %p195_p2 = scmp.lt.s32.totalorder %s597_s14, 3 }
   0x5   : > { %s688_s15 = smov (%p31_p1, %s29_s15), 0  ;;  %p196_p3 = pnand %p532_p0, %p195_p2 }
   0x6   : > { %p247_p4 = scmp.lt.s32.totalorder (!%p196_p3), %s589_s12, 1  ;;  %vm289_vm0 = vcmask (!%p196_p3), 3072   ;;  %v599_v0 = vmov (!%p196_p3), 0.0   ;;  %vm297_vm1 = vcmask (!%p196_p3), 1043456  }
   0x7   : > { %199 = sbr.rel (%p196_p3) target bundleno = 244 (0xf4), region = 28  ;;  %290 = vst.msk [vmem:[#allocation2] sm:$0xf] (!%p196_p3), %vm289_vm0, %v599_v0  ;;  %291 = vst.msk [vmem:[#allocation3] sm:$0xf] (!%p196_p3), %vm289_vm0, %v599_v0 }
   0xe   : > { %s690_s12 = smov (!%p247_p4, %s589_s12), 1  ;;  %v344_v53 = vld [vmem:[#allocation2] sm:$0xf]  ;;  %v357_v56 = vld [vmem:[#allocation3] sm:$0xf] }
   0xf   : > { %s541_s16 = sshll.u32 %s690_s12, 3  ;;  %s537_s23 = sshll.u32 %s690_s12, 2 }
  0x10   : > { %s254_s19 = scalar_lea.vmem %s681_s0, %s541_s16  ;;  %s266_s22 = scalar_lea.vmem %s682_s1, %s541_s16 }
  0x11   : > { %v292_v1 = vld [vmem:[%s254_s19] sm:$0xff]  ;;  %s276_s26 = scalar_lea.vmem %s683_s2, %s537_s23  ;;  %s284_s29 = scalar_lea.vmem %s684_s3, %s537_s23 }
  0x12   : > { %v295_v2 = vcombine.high %v292_v1, %v292_v1  ;;  %v298_v3 = vsel %vm297_vm1, %v292_v1, -inf  ;;  %v293_v39 = vld [vmem:[%s266_s22] sm:$0xff] }
  0x13   : > { %v299_v4 = vrot.slane %v298_v3, 4  ;;  %v343_v41 = vmul.f32 %v293_v39, %v293_v39 }
  0x14   : > { %v305_v5 = vsel %vm297_vm1, %v295_v2, -inf }
  0x15   : > { %v300_v6 = vmax.f32 %v298_v3, %v299_v4  ;;  %v306_v7 = vrot.slane %v305_v5, 4 }
  0x17   : > { %v301_v8 = vrot.slane %v300_v6, 2  ;;  %v307_v9 = vmax.f32 %v305_v5, %v306_v7 }
  0x19   : > { %v302_v10 = vmax.f32 %v300_v6, %v301_v8  ;;  %v308_v11 = vrot.slane %v307_v9, 2 }
  0x1b   : > { %v303_v12 = vrot.slane %v302_v10, 1  ;;  %v309_v13 = vmax.f32 %v307_v9, %v308_v11 }
  0x1d   : > { %v304_v14 = vmax.f32 %v302_v10, %v303_v12  ;;  %v310_v15 = vrot.slane %v309_v13, 1 }
  0x1f   : > { %v311_v16 = vmax.f32 %v309_v13, %v310_v15 }
  0x21   : > { %v314_v17 = vcombine.low %v304_v14, %v311_v16 }
  0x23   : > { %v316_v18 = vsub.f32 %v292_v1, %v314_v17 }
  0x25   : > { %v317_v19 = vmul.f32 1.442695, %v316_v18 }
  0x27   : > { %569 = vpow2.f32 %v317_v19 }
  0x31   : > { %v570_v20 = vpop.eup %569 }
  0x32   : > { %v320_v21 = vcombine.high %v570_v20, %v570_v20  ;;  %v322_v22 = vsel %vm297_vm1, %v570_v20, 0.0 }
  0x33   : > { %v323_v23 = vrot.slane %v322_v22, 4 }
  0x34   : > { %v329_v24 = vsel %vm297_vm1, %v320_v21, 0.0 }
  0x35   : > { %v324_v25 = vadd.f32 %v323_v23, %v322_v22  ;;  %v330_v26 = vrot.slane %v329_v24, 4 }
  0x37   : > { %v325_v27 = vrot.slane %v324_v25, 2  ;;  %v331_v28 = vadd.f32 %v330_v26, %v329_v24 }
  0x39   : > { %v326_v29 = vadd.f32 %v325_v27, %v324_v25  ;;  %v332_v30 = vrot.slane %v331_v28, 2 }
  0x3b   : > { %v327_v31 = vrot.slane %v326_v29, 1  ;;  %v333_v32 = vadd.f32 %v332_v30, %v331_v28 }
  0x3d   : > { %v328_v33 = vadd.f32 %v327_v31, %v326_v29  ;;  %v334_v34 = vrot.slane %v333_v32, 1 }
  0x3f   : > { %v335_v35 = vadd.f32 %v334_v34, %v333_v32  ;;  %571 = vrcp.f32 %v328_v33 }
  0x41   : > { %573 = vrcp.f32 %v335_v35 }
  0x49   : > { %v572_v36 = vpop.eup %571 }
  0x4b   : > { %v574_v37 = vpop.eup %573 }
  0x4c   : > { %v340_v38 = vcombine.low %v572_v36, %v574_v37 }
  0x4e   : > { %v342_v40 = vmul.f32 %v570_v20, %v340_v38 }
  0x50   : > { %v345_v42 = vmul.f32 %v342_v40, %v293_v39  ;;  %v358_v43 = vmul.f32 %v342_v40, %v342_v40 }
  0x52   : > { %v347_v44 = vcombine.high %v345_v42, %v345_v42  ;;  %v349_v45 = vsel %vm297_vm1, %v345_v42, 0.0  ;;  %v359_v46 = vadd.f32 %v358_v43, %v343_v41 }
  0x54   : > { %v350_v47 = vsel %vm297_vm1, %v347_v44, 0.0  ;;  %v361_v48 = vcombine.high %v359_v46, %v359_v46  ;;  %v363_v49 = vsel %vm297_vm1, %v359_v46, 0.0 }
  0x55   : > { %v351_v50 = vadd.f32 %v350_v47, %v349_v45 }
  0x56   : > { %v364_v51 = vsel %vm297_vm1, %v361_v48, 0.0 }
  0x57   : > { %352 = vadd.xlane.f32.xlu0 %v351_v50  ;;  %v365_v52 = vadd.f32 %v364_v51, %v363_v49 }
  0x5b   : > { %366 = vadd.xlane.f32.xlu0 %v365_v52 }
  0xe4   : > { %v353_v54 = vpop.xlane.xlu0 %352 }
  0xe5   : > { %v354_v55 = vadd.f32 %v353_v54, %v344_v53 }
  0xe7   : > { %356 = vst.msk [vmem:[#allocation2] sm:$0xf] %vm289_vm0, %v354_v55 }
  0xe8   : > { %v367_v57 = vpop.xlane.xlu0 %366 }
  0xe9   : > { %v368_v58 = vadd.f32 %v367_v57, %v357_v56 }
  0xeb   : > { %369 = vst.msk [vmem:[#allocation3] sm:$0xf] %vm289_vm0, %v368_v58 }
  0xee   : > { %v373_v59 = vld [vmem:[#allocation2] sm:$0xf] }
  0xef   : > { %374 = vst.msk [vmem:[%s276_s26] sm:$0xf] %vm289_vm0, %v373_v59 }
  0xf2   : > { %v375_v60 = vld [vmem:[#allocation3] sm:$0xf] }
  0xf3   : > { %376 = vst.msk [vmem:[%s284_s29] sm:$0xf] %vm289_vm0, %v375_v60 }
  0xf4 PF: > { %s14_s14 = sadd.s32 1, %s597_s14   ;;  %s685_s12 = smov %s593_s13 }
  0xf5   : > { %p11_p5 = scmp.ge.s32.totalorder %s14_s14, 4   ;;  %s686_s13 = smov %s688_s15 }
  0xf7   :  { %13 = sbr.rel (!%p11_p5) target bundleno = 2 (0x2), region = 81 }

</bundles_post_ra>
